<compile_context>
chip_gen: v7x
topology: tpu7x:2x2x1
jax: 0.10.0
libtpu: 0.0.40
codegen_flags: <defaults>
</compile_context>

<pallas_src>
import functools

import jax
import jax.numpy as jnp
from jax.experimental import pallas as pl
from jax.experimental.pallas import tpu as pltpu

LANE = 128


def _cdiv(a, b):
    return (a + b - 1) // b


def _pick_c_slab(c):
    # Sub-tile the channel (sublane) axis so hoisted accumulators + the current
    # chunk stay well under the 64-entry vreg file.
    if c <= 128:
        return c
    for cs in (64, 128, 32, 16, 8):
        if c % cs == 0:
            return cs
    return c


def channel_attention_kernel(x_ref, w1t_ref, w2t_ref, o_ref, sum_acc, max_acc,
                             *, hw, hw_tile, chunks, c_slab, needs_mask):
    # x_ref:   (1, C, hw_tile)   current batch row, current spatial tile
    # w1t_ref: (C, C//16)        fc1 weight, pre-transposed in the wrapper
    # w2t_ref: (C//16, C)        fc2 weight, pre-transposed in the wrapper
    # o_ref:   (1, 1, C)         attention weights for this batch row
    # sum_acc / max_acc: (1, C, LANE) f32 scratch (per-lane partial reductions)
    C = sum_acc.shape[1]
    n_slabs = C // c_slab
    k = pl.program_id(1)
    last = pl.num_programs(1) - 1

    @pl.when(k == 0)
    def _init():
        sum_acc[...] = jnp.zeros_like(sum_acc)
        max_acc[...] = jnp.full_like(max_acc, -jnp.inf)

    def accumulate(masked):
        if masked:
            # Hoisted out of the chunk loop (broadcast_in_dim is not CSE'd).
            lane = jax.lax.broadcasted_iota(jnp.int32, (1, c_slab, LANE), 2)
            rem = hw - k * hw_tile          # valid positions left in this tile
        for cs in range(n_slabs):
            c0 = cs * c_slab
            # Load accumulators once per slab, carry in vregs across all chunks,
            # write back once (removes per-chunk accumulator loads/stores).
            s = sum_acc[:, c0:c0 + c_slab, :]
            m = max_acc[:, c0:c0 + c_slab, :]
            for ci in range(chunks):
                chunk = x_ref[:, c0:c0 + c_slab,
                              ci * LANE:(ci + 1) * LANE].astype(jnp.float32)
                # Sum path is never masked: wrapper zero-padding contributes 0
                # and we divide by the true hw in the finalize branch.
                s = s + chunk
                if masked:
                    valid = lane < (rem - ci * LANE)
                    chunk = jnp.where(valid, chunk, -jnp.inf)
                m = jnp.maximum(m, chunk)
            sum_acc[:, c0:c0 + c_slab, :] = s
            max_acc[:, c0:c0 + c_slab, :] = m

    if needs_mask:
        @pl.when(k != last)
        def _steady():
            accumulate(masked=False)

        @pl.when(k == last)
        def _tail():
            accumulate(masked=True)
    else:
        accumulate(masked=False)

    @pl.when(k == last)
    def _finalize():
        avg = jnp.sum(sum_acc[...], axis=-1) * (1.0 / hw)    # (1, C)
        mx = jnp.max(max_acc[...], axis=-1)                  # (1, C)
        pooled = jnp.concatenate([avg, mx], axis=0)          # (2, C) merged fc pass
        w1t = w1t_ref[...].astype(jnp.float32)               # (C, C//16)
        w2t = w2t_ref[...].astype(jnp.float32)               # (C//16, C)
        hidden = jnp.maximum(
            jnp.dot(pooled, w1t, preferred_element_type=jnp.float32), 0.0)
        out2 = jnp.dot(hidden, w2t, preferred_element_type=jnp.float32)  # (2, C)
        att = jax.nn.sigmoid(out2[0:1, :] + out2[1:2, :])    # (1, C)
        o_ref[...] = att.reshape(o_ref.shape).astype(o_ref.dtype)


def channel_attention(x_nchw, w1, w2, *,
                      tile_bytes_budget=8 * 1024 * 1024,
                      max_unrolled_chunks=64,
                      vmem_limit_bytes=48 * 1024 * 1024):
    """x: (B, C, H, W); w1: (C//16, C); w2: (C, C//16). Returns sigmoid weights (B, C, 1, 1).

    tile_bytes_budget / vmem_limit_bytes defaults are safe on v7x (64 MiB VMEM per TC);
    on v5e / v6e (128 MiB physical VMEM) they can be raised to ~12-16 MiB / 64 MiB.
    """
    B, C, H, W = x_nchw.shape
    Ch = w1.shape[0]
    HW = H * W

    # Hoist weight transposes out of the kernel (layout plumbing, free in the wrapper).
    w1t = jnp.transpose(w1)   # (C, Ch)
    w2t = jnp.transpose(w2)   # (Ch, C)

    # ---- cdiv-based spatial tile selection ------------------------------------------
    n_chunks = _cdiv(HW, LANE)
    bytes_per_chunk = C * LANE * x_nchw.dtype.itemsize        # batch block dim is 1
    max_chunks_bytes = max(1, tile_bytes_budget // bytes_per_chunk)
    chunks_per_tile = max(1, min(n_chunks, max_chunks_bytes, max_unrolled_chunks))
    hw_tile = chunks_per_tile * LANE
    kt = _cdiv(n_chunks, chunks_per_tile)
    hw_total = kt * hw_tile
    needs_mask = hw_total != HW

    x_flat = x_nchw.reshape(B, C, HW)
    if needs_mask:
        # Zero-pad so the final block never reads garbage (zeros are sum-safe; the
        # max path masks them with -inf on the final tile only).
        x_flat = jnp.pad(x_flat, ((0, 0), (0, 0), (0, hw_total - HW)))

    c_slab = _pick_c_slab(C)

    kernel = functools.partial(
        channel_attention_kernel,
        hw=HW, hw_tile=hw_tile, chunks=chunks_per_tile,
        c_slab=c_slab, needs_mask=needs_mask)

    out = pl.pallas_call(
        kernel,
        out_shape=jax.ShapeDtypeStruct((B, 1, C), x_nchw.dtype),
        grid_spec=pltpu.PrefetchScalarGridSpec(
            num_scalar_prefetch=0,
            grid=(B, kt),
            in_specs=[
                pl.BlockSpec((1, C, hw_tile), lambda b, k: (b, 0, k)),
                pl.BlockSpec((C, Ch), lambda b, k: (0, 0)),
                pl.BlockSpec((Ch, C), lambda b, k: (0, 0)),
            ],
            out_specs=pl.BlockSpec((1, 1, C), lambda b, k: (b, 0, 0)),
            scratch_shapes=[
                pltpu.VMEM((1, C, LANE), jnp.float32),   # running sum
                pltpu.VMEM((1, C, LANE), jnp.float32),   # running max
            ],
        ),
        compiler_params=pltpu.CompilerParams(
            dimension_semantics=("parallel", "arbitrary"),
            vmem_limit_bytes=vmem_limit_bytes),
    )(x_flat, w1t, w2t)

    return out.reshape(B, C, 1, 1)


def channel_attention_ref(x_nchw, w1, w2):
    # Pure-JAX reference mirroring the PyTorch module.
    avg = jnp.mean(x_nchw, axis=(2, 3))   # (B, C)
    mx = jnp.max(x_nchw, axis=(2, 3))     # (B, C)

    def fc(p):
        h = jnp.maximum(p @ w1.T, 0.0)
        return h @ w2.T

    return jax.nn.sigmoid(fc(avg) + fc(mx))[:, :, None, None]


if __name__ == "__main__":
    # in_planes must be >= 16 because the module hard-codes in_planes // 16.
    B, C = 2, 64
    Ch = C // 16  # = 4

    key = jax.random.PRNGKey(0)
    kx, k1, k2, kx2, kx3 = jax.random.split(key, 5)
    # Conv2d(C, C//16, 1, bias=False) weight: (C//16, C, 1, 1) -> (C//16, C)
    w1 = jax.random.normal(k1, (Ch, C), dtype=jnp.float32) * 0.1
    # Conv2d(C//16, C, 1, bias=False) weight: (C, C//16, 1, 1) -> (C, C//16)
    w2 = jax.random.normal(k2, (C, Ch), dtype=jnp.float32) * 0.1

    # Case 1: HW = 16*16 = 256 (lane-aligned, single tile, no mask path).
    x = jax.random.normal(kx, (B, C, 16, 16), dtype=jnp.float32)
    out = jax.block_until_ready(channel_attention(x, w1, w2))
    ref = channel_attention_ref(x, w1, w2)
    assert out.shape == (B, C, 1, 1)
    assert jnp.allclose(out, ref, atol=1e-5, rtol=1e-5), "mismatch (aligned HW)"

    # Case 2: ragged HW = 13*13 = 169 exercises zero-pad + masked-max tail tile.
    x2 = jax.random.normal(kx2, (B, C, 13, 13), dtype=jnp.float32)
    out2 = jax.block_until_ready(channel_attention(x2, w1, w2))
    ref2 = channel_attention_ref(x2, w1, w2)
    assert jnp.allclose(out2, ref2, atol=1e-5, rtol=1e-5), "mismatch (ragged HW)"

    # Case 3: force multi-tile reduction (kt > 1) to exercise the steady-state
    # (unmasked) + final-tile (masked) accumulate branches together.
    x3 = jax.random.normal(kx3, (B, C, 20, 20), dtype=jnp.float32)   # HW = 400
    out3 = jax.block_until_ready(
        channel_attention(x3, w1, w2, tile_bytes_budget=1))          # 1 chunk / tile
    ref3 = channel_attention_ref(x3, w1, w2)
    assert jnp.allclose(out3, ref3, atol=1e-5, rtol=1e-5), "mismatch (multi-tile)"

    print("KERNEL_OK")
</pallas_src>

<mosaic_0001>
module attributes {stable_mosaic.version = 11 : i64} {
  func.func @channel_attention_kernel(%arg0: i32, %arg1: i32, %arg2: memref<1x64x256xf32, #tpu.memory_space<vmem>>, %arg3: memref<64x4xf32, #tpu.memory_space<vmem>>, %arg4: memref<4x64xf32, #tpu.memory_space<vmem>>, %arg5: memref<1x1x64xf32, #tpu.memory_space<vmem>>, %arg6: memref<1x64x128xf32, #tpu.memory_space<vmem>>, %arg7: memref<1x64x128xf32, #tpu.memory_space<vmem>>) attributes {dimension_semantics = [#tpu.dimension_semantics<parallel>, #tpu.dimension_semantics<arbitrary>], iteration_bounds = array<i64: 2, 1>, scalar_prefetch = 0 : i64, scratch_operands = 2 : i64, tpu.core_type = #tpu.core_type<tc>, window_params = [{transform_indices = @transform_0, window_bounds = array<i64: 1, 64, 256>}, {pipeline_mode = #tpu.pipeline_mode<synchronous>, transform_indices = @transform_1, window_bounds = array<i64: 64, 4>}, {pipeline_mode = #tpu.pipeline_mode<synchronous>, transform_indices = @transform_2, window_bounds = array<i64: 4, 64>}, {transform_indices = @transform_3, window_bounds = array<i64: 1, 1, 64>}]} {
    %c0_i32 = arith.constant 0 : i32
    %0 = arith.cmpi eq, %arg1, %c0_i32 : i32
    %1 = arith.extui %0 : i1 to i32
    %c0_i32_0 = arith.constant 0 : i32
    %2 = arith.cmpi ne, %1, %c0_i32_0 : i32
    scf.if %2 {
      %cst = arith.constant 0.000000e+00 : f32
      %16 = vector.broadcast %cst : f32 to vector<1x64x128xf32>
      %c0_19 = arith.constant 0 : index
      %c0_20 = arith.constant 0 : index
      %c0_21 = arith.constant 0 : index
      %17 = vector.load %arg6[%c0_19, %c0_20, %c0_21] : memref<1x64x128xf32, #tpu.memory_space<vmem>>, vector<1x64x128xf32>
      tpu.vector_store %arg6[%c0_19, %c0_20, %c0_21], %16 {strides = array<i32>} : memref<1x64x128xf32, #tpu.memory_space<vmem>>, vector<1x64x128xf32>,
      %cst_22 = arith.constant 0xFF800000 : f32
      %18 = vector.broadcast %cst_22 : f32 to vector<1x64x128xf32>
      %c0_23 = arith.constant 0 : index
      %c0_24 = arith.constant 0 : index
      %c0_25 = arith.constant 0 : index
      %19 = vector.load %arg7[%c0_23, %c0_24, %c0_25] : memref<1x64x128xf32, #tpu.memory_space<vmem>>, vector<1x64x128xf32>
      tpu.vector_store %arg7[%c0_23, %c0_24, %c0_25], %18 {strides = array<i32>} : memref<1x64x128xf32, #tpu.memory_space<vmem>>, vector<1x64x128xf32>,
    } else {
    }
    %c0 = arith.constant 0 : index
    %c0_1 = arith.constant 0 : index
    %c0_2 = arith.constant 0 : index
    %3 = vector.load %arg6[%c0, %c0_1, %c0_2] : memref<1x64x128xf32, #tpu.memory_space<vmem>>, vector<1x64x128xf32>
    %c0_3 = arith.constant 0 : index
    %c0_4 = arith.constant 0 : index
    %c0_5 = arith.constant 0 : index
    %4 = vector.load %arg7[%c0_3, %c0_4, %c0_5] : memref<1x64x128xf32, #tpu.memory_space<vmem>>, vector<1x64x128xf32>
    %c0_6 = arith.constant 0 : index
    %c0_7 = arith.constant 0 : index
    %c0_8 = arith.constant 0 : index
    %5 = vector.load %arg2[%c0_6, %c0_7, %c0_8] : memref<1x64x256xf32, #tpu.memory_space<vmem>>, vector<1x64x128xf32>
    %6 = arith.addf %3, %5 : vector<1x64x128xf32>
    %7 = arith.maximumf %4, %5 : vector<1x64x128xf32>
    %c0_9 = arith.constant 0 : index
    %c0_10 = arith.constant 0 : index
    %c128 = arith.constant 128 : index
    %8 = vector.load %arg2[%c0_9, %c0_10, %c128] : memref<1x64x256xf32, #tpu.memory_space<vmem>>, vector<1x64x128xf32>
    %9 = arith.addf %6, %8 : vector<1x64x128xf32>
    %10 = arith.maximumf %7, %8 : vector<1x64x128xf32>
    %c0_11 = arith.constant 0 : index
    %c0_12 = arith.constant 0 : index
    %c0_13 = arith.constant 0 : index
    %11 = vector.load %arg6[%c0_11, %c0_12, %c0_13] : memref<1x64x128xf32, #tpu.memory_space<vmem>>, vector<1x64x128xf32>
    tpu.vector_store %arg6[%c0_11, %c0_12, %c0_13], %9 {strides = array<i32>} : memref<1x64x128xf32, #tpu.memory_space<vmem>>, vector<1x64x128xf32>,
    %c0_14 = arith.constant 0 : index
    %c0_15 = arith.constant 0 : index
    %c0_16 = arith.constant 0 : index
    %12 = vector.load %arg7[%c0_14, %c0_15, %c0_16] : memref<1x64x128xf32, #tpu.memory_space<vmem>>, vector<1x64x128xf32>
    tpu.vector_store %arg7[%c0_14, %c0_15, %c0_16], %10 {strides = array<i32>} : memref<1x64x128xf32, #tpu.memory_space<vmem>>, vector<1x64x128xf32>,
    %c0_i32_17 = arith.constant 0 : i32
    %13 = arith.cmpi eq, %arg1, %c0_i32_17 : i32
    %14 = arith.extui %13 : i1 to i32
    %c0_i32_18 = arith.constant 0 : i32
    %15 = arith.cmpi ne, %14, %c0_i32_18 : i32
    scf.if %15 {
      %c0_19 = arith.constant 0 : index
      %c0_20 = arith.constant 0 : index
      %c0_21 = arith.constant 0 : index
      %16 = vector.load %arg6[%c0_19, %c0_20, %c0_21] : memref<1x64x128xf32, #tpu.memory_space<vmem>>, vector<1x64x128xf32>
      %cst = arith.constant dense<0.000000e+00> : vector<1x64xf32>
      %17 = vector.multi_reduction <add>, %16, %cst [2] : vector<1x64x128xf32> to vector<1x64xf32>
      %cst_22 = arith.constant 3.906250e-03 : f32
      %18 = vector.broadcast %cst_22 : f32 to vector<1x64xf32>
      %19 = arith.mulf %17, %18 : vector<1x64xf32>
      %c0_23 = arith.constant 0 : index
      %c0_24 = arith.constant 0 : index
      %c0_25 = arith.constant 0 : index
      %20 = vector.load %arg7[%c0_23, %c0_24, %c0_25] : memref<1x64x128xf32, #tpu.memory_space<vmem>>, vector<1x64x128xf32>
      %cst_26 = arith.constant dense<0xFF800000> : vector<1x64xf32>
      %21 = vector.multi_reduction <maximumf>, %20, %cst_26 [2] : vector<1x64x128xf32> to vector<1x64xf32>
      %22 = tpu.concatenate %19, %21 in 0 : vector<1x64xf32>, vector<1x64xf32> -> vector<2x64xf32>
      %c0_27 = arith.constant 0 : index
      %c0_28 = arith.constant 0 : index
      %23 = vector.load %arg3[%c0_27, %c0_28] : memref<64x4xf32, #tpu.memory_space<vmem>>, vector<64x4xf32>
      %c0_29 = arith.constant 0 : index
      %c0_30 = arith.constant 0 : index
      %24 = vector.load %arg4[%c0_29, %c0_30] : memref<4x64xf32, #tpu.memory_space<vmem>>, vector<4x64xf32>
      %cst_31 = arith.constant dense<0.000000e+00> : vector<2x4xf32>
      %25 = tpu.matmul %22, %23, %cst_31 {dimension_numbers = #tpu.dot_dimension_numbers<[1], [0], [0], [1], [0, 0, 1, 1], [], []>} : vector<2x64xf32>, vector<64x4xf32>, vector<2x4xf32> -> vector<2x4xf32>
      %cst_32 = arith.constant 0.000000e+00 : f32
      %26 = vector.broadcast %cst_32 : f32 to vector<2x4xf32>
      %27 = arith.maximumf %25, %26 : vector<2x4xf32>
      %cst_33 = arith.constant dense<0.000000e+00> : vector<2x64xf32>
      %28 = tpu.matmul %27, %24, %cst_33 {dimension_numbers = #tpu.dot_dimension_numbers<[1], [0], [0], [1], [0, 0, 1, 1], [], []>} : vector<2x4xf32>, vector<4x64xf32>, vector<2x64xf32> -> vector<2x64xf32>
      %29 = vector.extract_strided_slice %28 {offsets = [0, 0], sizes = [1, 64], strides = [1, 1]} : vector<2x64xf32> to vector<1x64xf32>
      %30 = vector.extract_strided_slice %28 {offsets = [1, 0], sizes = [1, 64], strides = [1, 1]} : vector<2x64xf32> to vector<1x64xf32>
      %31 = arith.addf %29, %30 : vector<1x64xf32>
      %32 = arith.negf %31 : vector<1x64xf32>
      %33 = math.exp %32 : vector<1x64xf32>
      %cst_34 = arith.constant 1.000000e+00 : f32
      %34 = vector.broadcast %cst_34 : f32 to vector<1x64xf32>
      %35 = arith.addf %34, %33 : vector<1x64xf32>
      %36 = arith.divf %34, %35 : vector<1x64xf32>
      %37 = vector.shape_cast %36 : vector<1x64xf32> to vector<1x1x64xf32>
      %c0_35 = arith.constant 0 : index
      %c0_36 = arith.constant 0 : index
      %c0_37 = arith.constant 0 : index
      %38 = vector.load %arg5[%c0_35, %c0_36, %c0_37] : memref<1x1x64xf32, #tpu.memory_space<vmem>>, vector<1x1x64xf32>
      tpu.vector_store %arg5[%c0_35, %c0_36, %c0_37], %37 {strides = array<i32>} : memref<1x1x64xf32, #tpu.memory_space<vmem>>, vector<1x1x64xf32>,
    } else {
    }
    return
  }
  func.func @transform_0(%arg0: i32, %arg1: i32) -> (i32, i32, i32) {
    %c0_i32 = arith.constant 0 : i32
    %c0_i32_0 = arith.constant 0 : i32
    return %arg0, %c0_i32, %arg1 : i32, i32, i32
  }
  func.func @transform_1(%arg0: i32, %arg1: i32) -> (i32, i32) {
    %c0_i32 = arith.constant 0 : i32
    %c0_i32_0 = arith.constant 0 : i32
    %c0_i32_1 = arith.constant 0 : i32
    return %c0_i32, %c0_i32_0 : i32, i32
  }
  func.func @transform_2(%arg0: i32, %arg1: i32) -> (i32, i32) {
    %c0_i32 = arith.constant 0 : i32
    %c0_i32_0 = arith.constant 0 : i32
    %c0_i32_1 = arith.constant 0 : i32
    return %c0_i32, %c0_i32_0 : i32, i32
  }
  func.func @transform_3(%arg0: i32, %arg1: i32) -> (i32, i32, i32) {
    %c0_i32 = arith.constant 0 : i32
    %c0_i32_0 = arith.constant 0 : i32
    %c0_i32_1 = arith.constant 0 : i32
    return %arg0, %c0_i32, %c0_i32_0 : i32, i32, i32
  }
}

</mosaic_0001>

<bundles_post_ra>
// kernel: tpu_custom_call.1
= control target key start
LH: loop header
LB: loop body
LE: loop exit
PB: predicated region body
PF: predicated region fallthrough
CT: control target
= control target key end

     0   :  { %8 = vsyncpa [#allocation5], 0  ;;  %s1245_s0 = inlined_call_operand.hbm [shape: f32[2,64,256], index: 0, kind: input, shape index: {}]   ;;  %s1246_s1 = inlined_call_operand.vmem [shape: f32[64,4], index: 1, kind: input, shape index: {}]   ;;  %s1247_s2 = inlined_call_operand.vmem [shape: f32[4,64], index: 2, kind: input, shape index: {}]   ;;  %s1248_s3 = inlined_call_operand.hbm [shape: f32[2,1,64], index: 3, kind: output, shape index: {}]  }
   0x1   :  { %10 = vsyncpa [#allocation5 + $0x1], 0 }
   0x2   :  { %11 = vsyncpa [#allocation6], 0 }
   0x3   :  { %13 = vsyncpa [#allocation6 + $0x1], 0  ;;  %s1018_s12 = smov 0   ;;  %s1020_s13 = smov 0  }
   0x4   :  { %s1022_s14 = smov 0   ;;  %s1024_s15 = smov 0  }
   0x5   :  { %s1026_s16 = smov 0   ;;  %s1028_s17 = smov 0  }
   0x6 LB: > { %s742_s18 = sadd.s32 4294967295, %s989_s17   ;;  %s743_s19 = sadd.s32 4294967294, %s989_s17   ;;  %s989_s17 = sphi %s1028_s17, %s19_s17   ;;  %s985_s16 = sphi %s1026_s16, %s1263_s16   ;;  %s981_s15 = sphi %s1024_s15, %s1262_s15   ;;  %s977_s14 = sphi %s1022_s14, %s1261_s14   ;;  %s973_s13 = sphi %s1020_s13, %s1260_s13   ;;  %s969_s12 = sphi %s1018_s12, %s1259_s12  }
   0x7   : > { %s31_s20 = sadd.s32 1, %s985_s16  ;;  %s40_s21 = sadd.s32 1, %s977_s14 }
   0x8   : > { %p33_p0 = scmp.ge.s32.totalorder %s31_s20, 2  ;;  %p47_p1 = scmp.ne.s32.totalorder %s977_s14, %s973_s13 }
   0x9   : > { %p48_p2 = scmp.eq.s32.totalorder %s989_s17, 0  ;;  %p53_p3 = scmp.ne.s32.totalorder %s973_s13, %s969_s12 }
   0xa   : > { %s1265_s20 = smov (%p33_p0, %s31_s20), 0  ;;  %p54_p5 = scmp.eq.s32.totalorder %s742_s18, 0 }
   0xb   : > { %p1059_p4 = por %p48_p2, %p47_p1  ;;  %s35_s23 = ssub.s32 %s985_s16, %s1265_s20 }
   0xc   : > { %p119_p6 = scmp.eq.s32.totalorder %s742_s18, 1  ;;  %p38_p7 = scmp.eq.s32.totalorder %s35_s23, 0 }
   0xd   : > { %p1065_p8 = por %p54_p5, %p53_p3  ;;  %p125_p10 = scmp.eq.s32.totalorder %s743_s19, 1 }
   0xe   : > { %p1069_p9 = por %p119_p6, %p47_p1  ;;  %p818_p13 = scmp.lt.s32.totalorder %s989_s17, 2 }
   0xf   : > { %s1074_s26 = scalar_select %p38_p7, %s977_s14, %s40_s21  }
  0x10   : > { %s1252_s25 = scalar_select %p1069_p9, 1, 0 }
  0x11   : > { %p1076_p11 = por %p125_p10, %p53_p3  ;;  %s151_s28 = sand.u32 1, %s977_s14  }
  0x12   : > { %s746_s29 = sshll.u32 %s151_s28, 7  ;;  %s758_s30 = sshll.u32 %s985_s16, 11 }
  0x13   : > { %s1253_s27 = scalar_select %p1076_p11, 1, 0 }
  0x14   : > { %s1087_s6 = scalar_lea.hbm %s1245_s0, %s758_s30  ;;  %s155_s7 = scalar_lea.vmem [#allocation4], %s746_s29 }
  0x15   : > { %s164_s8 = sshll.u32 %s155_s7, 4  ;;  %p1093_p0 = pnand %p818_p13, %p1059_p4  ;;  %s1089_s8 = int_to_ptr.vmem [resolvable:$true] %s164_s8 }
  0x16   : > { %s1098_s10 = scalar_lea.sflag [#allocation5], %s151_s28  ;;  %s877_s11 = scalar_lea.hbm %s1087_s6, 2048 }
  0x17   : > { %p878_p2 = scmp.ne.s32.totalorder %s1087_s6, %s877_s11  ;;  %p879_p3 = pneg %p1093_p0 }
  0x18   : > { %s882_s21 = scalar_lea.hbm %s1245_s0, 4096  ;;  %p883_p4 = scmp.lt.u32.totalorder %s1087_s6, %s1245_s0 }
  0x19   : > { %p880_p5 = pnand %p879_p3, %p878_p2  ;;  %p884_p7 = scmp.lt.u32.totalorder %s882_s21, %s877_s11 }
  0x1a   : > { %p886_p13 = scmp.lt.u32.totalorder %s877_s11, %s1087_s6 }
  0x1b   : > { %p881_p6 = pneg %p880_p5  ;;  %p885_p10 = por %p884_p7, %p883_p4 }
  0x1d   : > { %p887_p12 = por %p886_p13, %p885_p10 }
  0x1f   : > { %p888_p1 = pnand %p887_p12, %p881_p6 }
  0x21   : > { %891 = shalt.err (!%p888_p1)
}
  0x22   : > { %s892_s28 = scalar_lea.vmem %s1089_s8, 2048  ;;  %s991_s29 = smov [#allocation4]  }
  0x23   : > { %p893_p2 = scmp.ne.s32.totalorder %s1089_s8, %s892_s28  ;;  %s897_s30 = sshll.u32 %s991_s29, 4  ;;  %s898_s30 = int_to_ptr.vmem [resolvable:$false] %s897_s30 }
  0x24   : > { %s899_s4 = scalar_lea.vmem %s898_s30, 4096  ;;  %p900_p9 = scmp.lt.s32.totalorder %s1089_s8, %s898_s30 }
  0x25   : > { %p895_p5 = pnand %p893_p2, %p879_p3  ;;  %p901_p4 = scmp.lt.s32.totalorder %s899_s4, %s892_s28 }
  0x27   : > { %p896_p11 = pneg %p895_p5  ;;  %p902_p7 = por %p901_p4, %p900_p9 }
  0x29   : > { %p903_p10 = pnand %p902_p7, %p896_p11 }
  0x2b   : > { %906 = shalt.err (!%p903_p10)
}
  0x2c   : > { %s992_s5 = smov 256   ;;  %s993_s7 = smov 16  }
  0x2d   : > { %813 = dma.hbm_to_vmem [thread:$0]  (!%p1093_p0), %s1087_s6, 2048, %s1089_s8, %s1098_s10, %s992_s5, %s992_s5, %s993_s7  }
  0x2e   : > { %p172_p12 = scmp.lt.s32.totalorder %s989_s17, 3  ;;  %p1255_p1 = scmp.ge.s32.totalorder %s989_s17, 1 }
  0x30   : > { %p173_p3 = pnand %p1255_p1, %p172_p12 }
  0x31   : > { %s1130_s11 = sand.u32 (!%p173_p3), 1, %s973_s13  }
  0x32   : > { %176 = sbr.rel (%p173_p3) target bundleno = 707 (0x2c3), region = 32  ;;  %s750_s18 = sshll.u32 (!%p173_p3), %s1130_s11, 7 }
  0x33   : > { %s179_s19 = scalar_lea.sflag (!%p173_p3), [#allocation5], %s1130_s11  ;;  %s1134_s21 = scalar_lea.vmem (!%p173_p3), [#allocation4], %s750_s18 }
  0x39   : > { %960 = dma.done.wait (%p1065_p8), %s179_s19, 2048  }
  0x3a   : > { %962 = vsyncadd (%p1065_p8), %s179_s19, 4294965248  ;;  %v243_v0 = vld [vmem:[%s1134_s21 + $0x20] sm:$0xff]  ;;  %v267_v1 = vld [vmem:[%s1134_s21 + $0x28] sm:$0xff]  ;;  %v994_v35 = vmov 0.0|0.0   ;;  %vm995_vm0 = vmmov 0   ;;  %v996_v45 = vmov 0.0   ;;  %v372_v49 = vlaneseq }
  0x3b   : > { %v241_v2 = vld [vmem:[%s1134_s21] sm:$0xff]  ;;  %v275_v3 = vadd.f32 %v267_v1, %v243_v0  ;;  %v265_v4 = vld [vmem:[%s1134_s21 + $0x8] sm:$0xff]  ;;  %v244_v5 = vld [vmem:[%s1134_s21 + $0x30] sm:$0xff]  ;;  %v283_v16 = vmax.f32 %v243_v0, %v267_v1  ;;  %794 = vmatprep.subr.bf16.mxu0 %v994_v35  ;;  %786 = vmatprep.mubr.msk.f32.mxu0 %vm995_vm0, %v996_v45  ;;  %vm383_vm1 = vcmask 130112   ;;  %vm390_vm2 = vcmask 195712   ;;  %s755_s8 = sshll.u32 %s981_s15, 4 }
  0x3c   : > { %v268_v6 = vld [vmem:[%s1134_s21 + $0x38] sm:$0xff]  ;;  %v273_v7 = vadd.f32 %v265_v4, %v241_v2  ;;  %v242_v8 = vld [vmem:[%s1134_s21 + $0x10] sm:$0xff]  ;;  %v281_v13 = vmax.f32 %v241_v2, %v265_v4  ;;  %v245_v14 = vld [vmem:[%s1134_s21 + $0x40] sm:$0xff]  ;;  %789 = vmatprep.subr.mxu1 %v996_v45  ;;  %791 = vmatprep.mubr.msk.f32.mxu1 %vm995_vm0, %v996_v45  ;;  %v373_v52 = vand.u32 127, %v372_v49  ;;  %v375_v56 = vshrl.u32 %v372_v49, 7  ;;  %s203_s9 = scalar_lea.vmem [#allocation7], %s1130_s11  ;;  %s1196_s28 = scalar_lea.hbm %s1248_s3, %s755_s8 }
  0x3d   : > { %v266_v9 = vld [vmem:[%s1134_s21 + $0x18] sm:$0xff]  ;;  %320 = vadd.xlane.f32.xlu1 %v275_v3  ;;  %v276_v10 = vadd.f32 %v268_v6, %v244_v5  ;;  %v269_v15 = vld [vmem:[%s1134_s21 + $0x48] sm:$0xff]  ;;  %v246_v18 = vld [vmem:[%s1134_s21 + $0x50] sm:$0xff]  ;;  %v284_v20 = vmax.f32 %v244_v5, %v268_v6  ;;  %vm397_vm3 = vcmask 261312   ;;  %vm404_vm4 = vcmask 326912   ;;  %s665_s10 = sshll.u32 %s203_s9, 4  ;;  %s1198_s10 = int_to_ptr.vmem [resolvable:$true] %s665_s10 }
  0x3e   : > { %316 = vadd.xlane.f32.xlu0 %v273_v7  ;;  %v274_v11 = vadd.f32 %v266_v9, %v242_v8  ;;  %v282_v12 = vmax.f32 %v242_v8, %v266_v9  ;;  %v277_v17 = vadd.f32 %v269_v15, %v245_v14  ;;  %v270_v19 = vld [vmem:[%s1134_s21 + $0x58] sm:$0xff]  ;;  %v247_v22 = vld [vmem:[%s1134_s21 + $0x60] sm:$0xff]  ;;  %v271_v23 = vld [vmem:[%s1134_s21 + $0x68] sm:$0xff]  ;;  %v285_v24 = vmax.f32 %v245_v14, %v269_v15  ;;  %s653_s29 = scalar_lea.sflag [#allocation6], %s1130_s11  ;;  %s907_s30 = scalar_lea.vmem %s1198_s10, 16 }
  0x3f   : > { %v278_v21 = vadd.f32 %v270_v19, %v246_v18  ;;  %v279_v25 = vadd.f32 %v271_v23, %v247_v22  ;;  %v248_v26 = vld [vmem:[%s1134_s21 + $0x70] sm:$0xff]  ;;  %v272_v27 = vld [vmem:[%s1134_s21 + $0x78] sm:$0xff]  ;;  %v286_v28 = vmax.f32 %v246_v18, %v270_v19  ;;  %v287_v31 = vmax.f32 %v247_v22, %v271_v23  ;;  %v478_v32 = vld [vmem:[%s1246_s1] sm:$0xff]  ;;  %p908_p8 = scmp.ne.s32.totalorder %s1198_s10, %s907_s30  ;;  %p1256_p9 = scmp.ne.s32.totalorder %s1252_s25, 0 }
  0x40   : > { %v280_v29 = vadd.f32 %v272_v27, %v248_v26  ;;  %v288_v30 = vmax.f32 %v248_v26, %v272_v27  ;;  %v479_v33 = vld [vmem:[%s1246_s1 + $0x8] sm:$0xff]  ;;  %v480_v36 = vld [vmem:[%s1246_s1 + $0x10] sm:$0xff]  ;;  %v481_v37 = vld [vmem:[%s1246_s1 + $0x18] sm:$0xff]  ;;  %v378_v54 = vadd.s32 4294967288, %v373_v52  ;;  %v385_v60 = vadd.s32 4294967280, %v373_v52  ;;  %s997_s15 = smov [#allocation7]  }
  0x41   : > { %322 = vadd.xlane.f32.xlu1 %v276_v10  ;;  %v795_v34 = vpack.c.bf16 %v479_v33, %v478_v32  ;;  %v798_v38 = vpack.c.bf16 %v481_v37, %v480_v36  ;;  %v482_v39 = vld [vmem:[%s1246_s1 + $0x20] sm:$0xff]  ;;  %v483_v40 = vld [vmem:[%s1246_s1 + $0x28] sm:$0xff]  ;;  %v484_v42 = vld [vmem:[%s1246_s1 + $0x30] sm:$0xff]  ;;  %v376_v62 = vsub.s32 %v373_v52, %v375_v56  ;;  %v392_v0 = vadd.s32 4294967272, %v373_v52  ;;  %p909_p11 = pnand %p908_p8, %p1256_p9  ;;  %s911_s4 = sshll.u32 %s997_s15, 4  ;;  %s912_s4 = int_to_ptr.vmem [resolvable:$false] %s911_s4 }
  0x42   : > { %318 = vadd.xlane.f32.xlu0 %v274_v11  ;;  %v801_v41 = vpack.c.bf16 %v483_v40, %v482_v39  ;;  %v485_v43 = vld [vmem:[%s1246_s1 + $0x38] sm:$0xff]  ;;  %v381_v58 = vsub.s32 %v378_v54, %v375_v56  ;;  %v399_v2 = vadd.s32 4294967264, %v373_v52  ;;  %v406_v3 = vadd.s32 4294967256, %v373_v52  ;;  %s913_s5 = scalar_lea.vmem %s912_s4, 32  ;;  %p914_p6 = scmp.lt.s32.totalorder %s1198_s10, %s912_s4 }
  0x43   : > { %796 = vmatpush3.bf16.msra.mxu0 %v795_v34  ;;  %v804_v44 = vpack.c.bf16 %v485_v43, %v484_v42  ;;  %v388_v5 = vsub.s32 %v385_v60, %v375_v56  ;;  %v413_v8 = vadd.s32 4294967248, %v373_v52  ;;  %v395_v10 = vsub.s32 %v392_v0, %v375_v56  ;;  %p910_p0 = pneg %p909_p11  ;;  %p915_p13 = scmp.lt.s32.totalorder %s913_s5, %s907_s30 }
  0x44   : > { %797 = vmatprep.subr.bf16.mxu0 %v994_v35  ;;  %v402_v14 = vsub.s32 %v399_v2, %v375_v56  ;;  %vm411_vm5 = vcmask 392512   ;;  %vm418_vm6 = vcmask 458112   ;;  %vm425_vm7 = vcmask 523712  }
  0x45   : > { %350 = vmax.xlane.f32.xlu1 %v282_v12  ;;  %v416_v23 = vsub.s32 %v413_v8, %v375_v56  ;;  %vm476_vm8 = vcmask 1040384   ;;  %vm487_vm9 = vcmask 523264   ;;  %vm566_vm10 = vcmask 1043456   ;;  %p916_p2 = por %p915_p13, %p914_p6 }
  0x46   : > { %348 = vmax.xlane.f32.xlu0 %v281_v13  ;;  %v420_v13 = vadd.s32 4294967240, %v373_v52  ;;  %vm562_vm11 = vcmask 31744   ;;  %vm650_vm12 = vcmask 516096  }
  0x47   : > { %799 = vmatpush3.bf16.msra.mxu0 %v798_v38  ;;  %p917_p5 = pnand %p916_p2, %p910_p0 }
  0x48   : > { %800 = vmatprep.subr.bf16.mxu0 %v994_v35 }
  0x49   : > { %352 = vmax.xlane.f32.xlu1 %v283_v16  ;;  %v409_v16 = vsub.s32 %v406_v3, %v375_v56 }
  0x4a   : > { %324 = vadd.xlane.f32.xlu0 %v277_v17 }
  0x4b   : > { %802 = vmatpush3.bf16.msra.mxu0 %v801_v41 }
  0x4c   : > { %803 = vmatprep.subr.bf16.mxu0 %v994_v35 }
  0x4d   : > { %354 = vmax.xlane.f32.xlu1 %v284_v20 }
  0x4e   : > { %326 = vadd.xlane.f32.xlu0 %v278_v21 }
  0x4f   : > { %805 = vmatpush3.bf16.msra.mxu0 %v804_v44 }
  0x51   : > { %356 = vmax.xlane.f32.xlu1 %v285_v24 }
  0x52   : > { %328 = vadd.xlane.f32.xlu0 %v279_v25 }
  0x55   : > { %358 = vmax.xlane.f32.xlu1 %v286_v28  ;;  %v423_v28 = vsub.s32 %v420_v13, %v375_v56 }
  0x56   : > { %330 = vadd.xlane.f32.xlu0 %v280_v29 }
  0x59   : > { %362 = vmax.xlane.f32.xlu1 %v288_v30 }
  0x5a   : > { %360 = vmax.xlane.f32.xlu0 %v287_v31 }
  0xca   : > { %v321_v46 = vpop.xlane.xlu1 %320 }
  0xcb   : > { %v317_v47 = vpop.xlane.xlu0 %316  ;;  %v334_v6 = vmul.f32 0.00390625, %v321_v46 }
  0xcc   : > { %v332_v63 = vmul.f32 0.00390625, %v317_v47 }
  0xcd   : > { %v389_v21 = vrot.slane %v334_v6, %v388_v5 }
  0xce   : > { %v323_v48 = vpop.xlane.xlu1 %322  ;;  %v377_v9 = vrot.slane %v332_v63, %v376_v62 }
  0xcf   : > { %v319_v50 = vpop.xlane.xlu0 %318  ;;  %v335_v11 = vmul.f32 0.00390625, %v323_v48 }
  0xd0   : > { %v333_v59 = vmul.f32 0.00390625, %v319_v50 }
  0xd1   : > { %v396_v26 = vrot.slane %v335_v11, %v395_v10 }
  0xd2   : > { %v351_v51 = vpop.xlane.xlu1 %350  ;;  %v382_v4 = vrot.slane %v333_v59, %v381_v58 }
  0xd3   : > { %v349_v53 = vpop.xlane.xlu0 %348  ;;  %v443_v18 = vrot.slane %v351_v51, %v381_v58 }
  0xd4   : > { %v384_v17 = vsel %vm383_vm1, %v382_v4, %v377_v9  ;;  %v439_v19 = vrot.slane %v349_v53, %v376_v62 }
  0xd5   : > { %v391_v30 = vsel %vm390_vm2, %v389_v21, %v384_v17 }
  0xd6   : > { %v353_v55 = vpop.xlane.xlu1 %352  ;;  %v444_v34 = vsel %vm383_vm1, %v443_v18, %v439_v19  ;;  %v398_v40 = vsel %vm397_vm3, %v396_v26, %v391_v30 }
  0xd7   : > { %v325_v57 = vpop.xlane.xlu0 %324  ;;  %v448_v22 = vrot.slane %v353_v55, %v388_v5  ;;  %v486_v55 = vld [vmem:[%s1247_s2] sm:$0xf] }
  0xd8   : > { %v336_v15 = vmul.f32 0.00390625, %v325_v57  ;;  %790 = vmatpush3.msk.msra.mxu1 %vm566_vm10, %v486_v55 }
  0xd9   : > { %v449_v37 = vsel %vm390_vm2, %v448_v22, %v444_v34 }
  0xda   : > { %v355_v61 = vpop.xlane.xlu1 %354  ;;  %v403_v31 = vrot.slane %v336_v15, %v402_v14 }
  0xdb   : > { %v327_v1 = vpop.xlane.xlu0 %326  ;;  %v453_v27 = vrot.slane %v355_v61, %v395_v10 }
  0xdc   : > { %v337_v20 = vmul.f32 0.00390625, %v327_v1  ;;  %v405_v45 = vsel %vm404_vm4, %v403_v31, %v398_v40 }
  0xdd   : > { %v454_v41 = vsel %vm397_vm3, %v453_v27, %v449_v37 }
  0xde   : > { %v357_v7 = vpop.xlane.xlu1 %356  ;;  %v410_v35 = vrot.slane %v337_v20, %v409_v16 }
  0xdf   : > { %v329_v12 = vpop.xlane.xlu0 %328  ;;  %v458_v32 = vrot.slane %v357_v7, %v402_v14 }
  0xe0   : > { %v338_v24 = vmul.f32 0.00390625, %v329_v12  ;;  %v412_v48 = vsel %vm411_vm5, %v410_v35, %v405_v45 }
  0xe1   : > { %v459_v46 = vsel %vm404_vm4, %v458_v32, %v454_v41 }
  0xe2   : > { %v359_v25 = vpop.xlane.xlu1 %358  ;;  %v417_v38 = vrot.slane %v338_v24, %v416_v23 }
  0xe3   : > { %v331_v29 = vpop.xlane.xlu0 %330  ;;  %v463_v36 = vrot.slane %v359_v25, %v409_v16 }
  0xe4   : > { %v339_v33 = vmul.f32 0.00390625, %v331_v29  ;;  %v419_v50 = vsel %vm418_vm6, %v417_v38, %v412_v48 }
  0xe5   : > { %v464_v49 = vsel %vm411_vm5, %v463_v36, %v459_v46 }
  0xe6   : > { %v363_v39 = vpop.xlane.xlu1 %362  ;;  %v424_v42 = vrot.slane %v339_v33, %v423_v28 }
  0xe7   : > { %v361_v43 = vpop.xlane.xlu0 %360  ;;  %v473_v44 = vrot.slane %v363_v39, %v423_v28 }
  0xe8   : > { %v468_v47 = vrot.slane %v361_v43, %v416_v23  ;;  %v426_v53 = vsel %vm425_vm7, %v424_v42, %v419_v50 }
  0xea   : > { %v469_v51 = vsel %vm418_vm6, %v468_v47, %v464_v49 }
  0xeb   : > { %v474_v52 = vsel %vm425_vm7, %v473_v44, %v469_v51 }
  0xec   : > { %v477_v54 = vsel %vm476_vm8, %v426_v53, %v474_v52 }
  0xed   : > { %787 = vmatmul.mubr.msk.f32.vlgmr.msra.gmra.mrb[0].mxu0 %vm487_vm9, %v477_v54 }
 0x1c0   : > { %v557_v56 = vpop.f32.mrb[0].mxu0 }
 0x1c1   : > { %v561_v57 = vmax.f32 %v557_v56, 0.0  ;;  %v788_v58 = vpop.f32.mrb[1].mxu0 }
 0x1c3   : > { %792 = vmatmul.mubr.msk.f32.vlgmr.msra.gmra.mrb[0].mxu1 %vm562_vm11, %v561_v57 }
 0x296   : > { %v636_v59 = vpop.f32.mrb[0].mxu1 }
 0x297   : > { %v641_v60 = vrot.slane %v636_v59, 1  ;;  %v793_v61 = vpop.f32.mrb[1].mxu1 }
 0x299   : > { %v643_v62 = vadd.f32 %v641_v60, %v636_v59 }
 0x29b   : > { %v754_v63 = vmul.f32 -1.442695, %v643_v62 }
 0x29d   : > { %873 = vpow2.f32 %v754_v63 }
 0x2a7   : > { %v874_v0 = vpop.eup %873 }
 0x2a8   : > { %v647_v1 = vadd.f32 1.0, %v874_v0 }
 0x2aa   : > { %875 = vrcp.f32 %v647_v1 }
 0x2b4   : > { %v876_v2 = vpop.eup %875 }
 0x2b5   : > { %651 = vst.msk [vmem:[%s203_s9] sm:$0x1] %vm650_vm12, %v876_v2 }
 0x2b6   : > { %920 = shalt.err (!%p917_p5)
}
 0x2b7   : > { %s921_s11 = scalar_lea.hbm %s1196_s28, 16  ;;  %s925_s19 = scalar_lea.hbm %s1248_s3, 32 }
 0x2b8   : > { %p922_p4 = scmp.ne.s32.totalorder %s1196_s28, %s921_s11  ;;  %p926_p12 = scmp.lt.u32.totalorder %s1196_s28, %s1248_s3 }
 0x2b9   : > { %p927_p1 = scmp.lt.u32.totalorder %s925_s19, %s921_s11  ;;  %p929_p8 = scmp.lt.u32.totalorder %s921_s11, %s1196_s28 }
 0x2ba   : > { %p923_p7 = pnand %p922_p4, %p1256_p9 }
 0x2bb   : > { %p928_p3 = por %p927_p1, %p926_p12 }
 0x2bc   : > { %p924_p10 = pneg %p923_p7 }
 0x2bd   : > { %p930_p11 = por %p929_p8, %p928_p3 }
 0x2bf   : > { %p931_p0 = pnand %p930_p11, %p924_p10 }
 0x2c1   : > { %934 = shalt.err (!%p931_p0)
}
 0x2c2   : > { %808 = dma.vmem_to_hbm [thread:$0]  (%p1256_p9), %s1198_s10, 16, %s1196_s28, %s653_s29  }
 0x2c3 PF: > { %s677_s6 = sand.u32 1, %s969_s12   ;;  %p1257_p6 = scmp.ne.s32.totalorder %s1253_s27, 0 }
 0x2c4   : > { %p1258_p13 = scmp.ge.s32.totalorder %s989_s17, 2  ;;  %s678_s8 = scalar_lea.sflag [#allocation6], %s677_s6 }
 0x2c6   : > { %p815_p2 = pnand %p1258_p13, %p1257_p6 }
 0x2c8   : > { %964 = dma.done.wait (!%p815_p2), %s678_s8, 16  }
 0x2c9   : > { %966 = vsyncadd (!%p815_p2), %s678_s8, 4294967280  ;;  %s19_s17 = sadd.s32 1, %s989_s17   ;;  %s1259_s12 = smov %s973_s13 }
 0x2ca   : > { %p16_p5 = scmp.ge.s32.totalorder %s19_s17, 4   ;;  %s1260_s13 = smov %s977_s14 }
 0x2cb   : > { %s1261_s14 = smov %s1074_s26  ;;  %s1262_s15 = smov %s985_s16 }
 0x2cc   : > { %s1263_s16 = smov %s1265_s20  ;;  %18 = sbr.rel (!%p16_p5) target bundleno = 6 (0x6), region = 85 }
 0x2d3   :  { %682 = vsyncpa [#allocation5], 1 }
 0x2d4   :  { %684 = vsyncpa [#allocation5 + $0x1], 1 }
 0x2d5   :  { %685 = vsyncpa [#allocation6], 1 }
 0x2d6   :  { %687 = vsyncpa [#allocation6 + $0x1], 1 }

</bundles_post_ra>
